<compile_context>
chip_gen: v7x
topology: tpu7x:2x2x1
jax: 0.10.0
libtpu: 0.0.40
codegen_flags: <defaults>
</compile_context>

<pallas_src>
import functools

import jax
import jax.numpy as jnp
from jax import lax
from jax.experimental import pallas as pl
from jax.experimental.pallas import tpu as pltpu


# ---------------------------------------------------------------------------
# Kernel body
# ---------------------------------------------------------------------------
def _conv1x1_kernel(x_ref, w_ref, b_ref, o_ref, *, bf16_matmul):
    # x_ref: (C_in, THW)   w_ref: (TCO, C_in)   b_ref: (TCO, 1)   o_ref: (TCO, THW)
    x = x_ref[...]
    w = w_ref[...]
    if bf16_matmul:
        # Weight was cast to bf16 once in the wrapper; cast the activation tile
        # here (VPU filler under the DMA).  Accumulation stays in f32.
        x = x.astype(jnp.bfloat16)
    acc = lax.dot_general(
        w, x,
        dimension_numbers=(((1,), (0,)), ((), ())),
        preferred_element_type=jnp.float32)
    acc = acc + b_ref[...].astype(jnp.float32)
    o_ref[...] = acc.astype(o_ref.dtype)


# ---------------------------------------------------------------------------
# Tile-size policy
# ---------------------------------------------------------------------------
def _round_down_128(v):
    return (v // 128) * 128


def _round_up_128(v):
    return ((v + 127) // 128) * 128


def _vmem_budgets():
    """(tile_budget_bytes, vmem_limit_bytes) per TPU generation."""
    small = (20 << 20, 42 << 20)   # safe on v7x's 64 MiB/TensorCore VMEM
    big = (56 << 20, 88 << 20)     # v4 / v5e / v5p / v6e: 128 MiB VMEM
    try:
        kind = jax.devices()[0].device_kind.lower()
    except Exception:  # no TPU visible at trace time -> be conservative
        return small
    if any(tag in kind for tag in ("v4", "v5", "v6")):
        return big
    return small                   # v7x-class / unknown -> conservative


def _choose_tiles(n, hw, c_in, c_out, x_itemsize, w_itemsize, b_itemsize,
                  tile_budget):
    """Pick (thw, tco, x_buffers) so double-buffered tiles fit `tile_budget`."""

    def weight_bytes(tco):
        # Weight + bias blocks are double-buffered by the pipeline even with a
        # constant index_map, so count them against the budget.
        return 2 * tco * c_in * w_itemsize + 2 * tco * b_itemsize

    def max_thw(tco, x_buffers):
        avail = tile_budget - weight_bytes(tco)
        if avail <= 0:
            return 0
        per_thw = x_buffers * c_in * x_itemsize + 2 * tco * x_itemsize
        return _round_down_128(avail // per_thw)

    # 1) Try keeping the whole C_out resident (single weight block).
    tco = c_out
    thw = max_thw(tco, 2)

    # 2) Large channel counts: tile C_out rather than shrink THW below ~512.
    if thw < 512 and c_out > 256:
        for cand in (256, 128):
            if cand < c_out and max_thw(cand, 2) > thw:
                tco = cand
                thw = max_thw(cand, 2)
                break

    thw_budget = max(thw, 128)
    budget_limited = thw_budget < hw
    thw = min(thw_budget, hw)      # full-extent last-dim block is always legal

    num_co = pl.cdiv(c_out, tco)

    # 3) Keep both v7x TensorCores busy: guarantee >= 2 parallel grid steps
    #    for single-image inference (harmless on single-core chips).
    if n == 1 and num_co == 1 and hw > 128 and thw >= hw:
        thw = _round_up_128(-(-hw // 2))   # ceil(hw/2) rounded up to 128

    # 4) Deeper pipelining on the activation input only when the budget forced
    #    small tiles (large channels) and a third buffer still fits.
    x_buffers = 2
    if budget_limited and thw <= 512:
        foot3 = weight_bytes(tco) + (3 * c_in + 2 * tco) * thw * x_itemsize
        if foot3 <= tile_budget:
            x_buffers = 3

    return thw, tco, x_buffers


def _x_block_spec(c_in, thw, x_buffers):
    index_map = lambda b, j, co: (b, 0, j)
    if x_buffers != 2:
        try:
            return pl.BlockSpec((None, c_in, thw), index_map,
                                pipeline_mode=pl.Buffered(x_buffers))
        except TypeError:
            pass  # pipeline_mode unavailable -> default double-buffering
    return pl.BlockSpec((None, c_in, thw), index_map)


# ---------------------------------------------------------------------------
# Wrapper
# ---------------------------------------------------------------------------
def cnn1x1_forward(x_nchw, weight, bias=None, *, bf16_matmul=None):
    """Equivalent of `nn.Conv2d(dim1, dim2, kernel_size=1, bias=True)(x)`.

    x_nchw: (N, C_in, H, W); weight: (C_out, C_in, 1, 1); bias: (C_out,) or None.
    returns: (N, C_out, H, W)
    """
    n, c_in, h, w_sp = x_nchw.shape
    c_out = weight.shape[0]
    hw = h * w_sp

    if bias is None:
        bias = jnp.zeros((c_out,), dtype=x_nchw.dtype)

    # NCHW -> (N, C_in, H*W): collapses contiguous trailing dims, free reshape.
    x3 = x_nchw.reshape(n, c_in, hw)
    w_mat = weight.reshape(c_out, c_in)
    b2 = bias.reshape(c_out, 1)

    # bf16 MXU path: only auto-enabled where the fp32-emulation cost dominates.
    if bf16_matmul is None:
        bf16_matmul = bool(
            x_nchw.dtype == jnp.bfloat16
            or (x_nchw.dtype == jnp.float32 and c_in >= 512 and c_out >= 512))
    if bf16_matmul:
        w_mat = w_mat.astype(jnp.bfloat16)

    tile_budget, vmem_limit = _vmem_budgets()
    x_itemsize = x3.dtype.itemsize
    w_itemsize = w_mat.dtype.itemsize
    b_itemsize = b2.dtype.itemsize
    thw, tco, x_buffers = _choose_tiles(
        n, hw, c_in, c_out, x_itemsize, w_itemsize, b_itemsize, tile_budget)

    # Grid order (batch, hw-tile, cout-tile): the C_out axis iterates fastest so
    # the (large) activation block index is unchanged across it (no re-fetch).
    grid = (n, pl.cdiv(hw, thw), pl.cdiv(c_out, tco))

    out = pl.pallas_call(
        functools.partial(_conv1x1_kernel, bf16_matmul=bf16_matmul),
        out_shape=jax.ShapeDtypeStruct((n, c_out, hw), x_nchw.dtype),
        grid_spec=pl.GridSpec(
            grid=grid,
            in_specs=[
                _x_block_spec(c_in, thw, x_buffers),            # activations
                pl.BlockSpec((tco, c_in), lambda b, j, co: (co, 0)),   # weight
                pl.BlockSpec((tco, 1), lambda b, j, co: (co, 0)),      # bias
            ],
            out_specs=pl.BlockSpec((None, tco, thw), lambda b, j, co: (b, co, j)),
        ),
        compiler_params=pltpu.CompilerParams(
            dimension_semantics=("parallel", "parallel", "parallel"),
            vmem_limit_bytes=vmem_limit),
    )(x3, w_mat, b2)

    # (N, C_out, H*W) -> (N, C_out, H, W): free reshape.
    return out.reshape(n, c_out, h, w_sp)


def init_cnn1x1_params(key, dim1, dim2):
    """Deterministic init mirroring PyTorch Conv2d default (kaiming-uniform-ish)."""
    k_w, k_b = jax.random.split(key)
    fan_in = dim1  # kernel_size = 1
    bound = 1.0 / jnp.sqrt(fan_in)
    weight = jax.random.uniform(
        k_w, (dim2, dim1, 1, 1), minval=-bound, maxval=bound, dtype=jnp.float32)
    bias = jax.random.uniform(
        k_b, (dim2,), minval=-bound, maxval=bound, dtype=jnp.float32)
    return weight, bias


if __name__ == "__main__":
    key = jax.random.PRNGKey(0)
    k1, k2, k3, k4 = jax.random.split(key, 4)

    def ref_conv1x1(x, w, b):
        co, ci = w.shape[0], w.shape[1]
        return (jnp.einsum("nchw,oc->nohw", x, w.reshape(co, ci))
                + b.reshape(1, co, 1, 1))

    fwd = jax.jit(cnn1x1_forward)

    # Case 1: small shape matching the module defaults (single full-HW tile).
    N, C_IN, C_OUT, H, W = 2, 4, 4, 16, 16
    x1 = jax.random.normal(k1, (N, C_IN, H, W), dtype=jnp.float32)
    w1, b1 = init_cnn1x1_params(k2, C_IN, C_OUT)
    y1 = fwd(x1, w1, b1)
    jax.block_until_ready(y1)
    assert y1.shape == (N, C_OUT, H, W)
    assert jnp.allclose(y1, ref_conv1x1(x1, w1, b1), atol=1e-5, rtol=1e-5)

    # Case 2: single batch with H*W not a multiple of 128 -> exercises the
    # masked partial HW block and the >=2-grid-step split (v7x megacore path).
    N2, CI2, CO2, H2, W2 = 1, 3, 5, 9, 15
    x2 = jax.random.normal(k3, (N2, CI2, H2, W2), dtype=jnp.float32)
    w2, b2 = init_cnn1x1_params(k4, CI2, CO2)
    y2 = fwd(x2, w2, b2)
    jax.block_until_ready(y2)
    assert y2.shape == (N2, CO2, H2, W2)
    assert jnp.allclose(y2, ref_conv1x1(x2, w2, b2), atol=1e-5, rtol=1e-5)

    print("KERNEL_OK")
</pallas_src>

<mosaic_0001>
module attributes {stable_mosaic.version = 11 : i64} {
  func.func @_conv1x1_kernel(%arg0: i32, %arg1: i32, %arg2: i32, %arg3: memref<1x4x256xf32, #tpu.memory_space<vmem>>, %arg4: memref<4x4xf32, #tpu.memory_space<vmem>>, %arg5: memref<4x1xf32, #tpu.memory_space<vmem>>, %arg6: memref<1x4x256xf32, #tpu.memory_space<vmem>>) attributes {dimension_semantics = [#tpu.dimension_semantics<parallel>, #tpu.dimension_semantics<parallel>, #tpu.dimension_semantics<parallel>], iteration_bounds = array<i64: 2, 1, 1>, scalar_prefetch = 0 : i64, scratch_operands = 0 : i64, tpu.core_type = #tpu.core_type<tc>, window_params = [{transform_indices = @transform_0, window_bounds = array<i64: 1, 4, 256>}, {transform_indices = @transform_1, window_bounds = array<i64: 4, 4>}, {transform_indices = @transform_2, window_bounds = array<i64: 4, 1>}, {transform_indices = @transform_3, window_bounds = array<i64: 1, 4, 256>}]} {
    %c0 = arith.constant 0 : index
    %c0_0 = arith.constant 0 : index
    %c0_1 = arith.constant 0 : index
    %0 = vector.load %arg3[%c0, %c0_0, %c0_1] : memref<1x4x256xf32, #tpu.memory_space<vmem>>, vector<1x4x256xf32>
    %1 = vector.shape_cast %0 : vector<1x4x256xf32> to vector<4x256xf32>
    %c0_2 = arith.constant 0 : index
    %c0_3 = arith.constant 0 : index
    %2 = vector.load %arg4[%c0_2, %c0_3] : memref<4x4xf32, #tpu.memory_space<vmem>>, vector<4x4xf32>
    %cst = arith.constant dense<0.000000e+00> : vector<4x256xf32>
    %3 = tpu.matmul %2, %1, %cst {dimension_numbers = #tpu.dot_dimension_numbers<[1], [0], [0], [1], [0, 0, 1, 1], [], []>} : vector<4x4xf32>, vector<4x256xf32>, vector<4x256xf32> -> vector<4x256xf32>
    %c0_4 = arith.constant 0 : index
    %c0_5 = arith.constant 0 : index
    %4 = vector.load %arg5[%c0_4, %c0_5] : memref<4x1xf32, #tpu.memory_space<vmem>>, vector<4x1xf32>
    %5 = vector.broadcast %4 : vector<4x1xf32> to vector<4x256xf32>
    %6 = arith.addf %3, %5 : vector<4x256xf32>
    %c0_6 = arith.constant 0 : index
    %c0_7 = arith.constant 0 : index
    %c0_8 = arith.constant 0 : index
    %7 = vector.load %arg6[%c0_6, %c0_7, %c0_8] : memref<1x4x256xf32, #tpu.memory_space<vmem>>, vector<1x4x256xf32>
    %8 = vector.shape_cast %7 : vector<1x4x256xf32> to vector<4x256xf32>
    %9 = vector.shape_cast %6 : vector<4x256xf32> to vector<1x4x256xf32>
    tpu.vector_store %arg6[%c0_6, %c0_7, %c0_8], %9 {strides = array<i32>} : memref<1x4x256xf32, #tpu.memory_space<vmem>>, vector<1x4x256xf32>,
    return
  }
  func.func @transform_0(%arg0: i32, %arg1: i32, %arg2: i32) -> (i32, i32, i32) {
    %c0_i32 = arith.constant 0 : i32
    %c0_i32_0 = arith.constant 0 : i32
    return %arg0, %c0_i32, %arg1 : i32, i32, i32
  }
  func.func @transform_1(%arg0: i32, %arg1: i32, %arg2: i32) -> (i32, i32) {
    %c0_i32 = arith.constant 0 : i32
    %c0_i32_0 = arith.constant 0 : i32
    return %arg2, %c0_i32 : i32, i32
  }
  func.func @transform_2(%arg0: i32, %arg1: i32, %arg2: i32) -> (i32, i32) {
    %c0_i32 = arith.constant 0 : i32
    %c0_i32_0 = arith.constant 0 : i32
    return %arg2, %c0_i32 : i32, i32
  }
  func.func @transform_3(%arg0: i32, %arg1: i32, %arg2: i32) -> (i32, i32, i32) {
    %c0_i32 = arith.constant 0 : i32
    return %arg0, %arg2, %arg1 : i32, i32, i32
  }
}

</mosaic_0001>

<bundles_post_ra>
// kernel: cnn1x1_forward.1
= control target key start
LH: loop header
LB: loop body
LE: loop exit
PB: predicated region body
PF: predicated region fallthrough
CT: control target
= control target key end

     0   :  { %s584_s12 = smov 0   ;;  %s586_s13 = smov 0   ;;  %s623_s0 = inlined_call_operand.vmem [shape: f32[2,4,256], index: 0, kind: input, shape index: {}]   ;;  %s624_s1 = inlined_call_operand.vmem [shape: f32[4,4], index: 1, kind: input, shape index: {}]   ;;  %s625_s2 = inlined_call_operand.vmem [shape: f32[4,1], index: 2, kind: input, shape index: {}]   ;;  %s626_s3 = inlined_call_operand.vmem [shape: f32[2,4,256], index: 3, kind: output, shape index: {}]  }
   0x1   :  { %s588_s14 = smov 0  }
   0x2 LB: > { %s32_s15 = sadd.s32 1, %s556_s13  ;;  %p498_p0 = scmp.ge.s32.totalorder %s560_s14, 1  ;;  %s560_s14 = sphi %s588_s14, %s13_s14   ;;  %s556_s13 = sphi %s586_s13, %s628_s13   ;;  %s552_s12 = sphi %s584_s12, %s627_s12  }
   0x3   : > { %p34_p1 = scmp.ge.s32.totalorder %s32_s15, 2  ;;  %p185_p2 = scmp.lt.s32.totalorder %s560_s14, 3 }
   0x5   : > { %s630_s15 = smov (%p34_p1, %s32_s15), 0  ;;  %p186_p3 = pnand %p498_p0, %p185_p2 }
   0x6   : > { %p230_p4 = scmp.lt.s32.totalorder (!%p186_p3), %s552_s12, 1  ;;  %v562_v0 = vmov (!%p186_p3), 0.0   ;;  %v263_v1 = vld [vmem:[%s625_s2] sm:$0xf] (!%p186_p3)  ;;  %v563_v2 = vmov (!%p186_p3), 0   ;;  %vm275_vm0 = vcmask (!%p186_p3), 1043456  }
   0x7   : > { %189 = sbr.rel (%p186_p3) target bundleno = 240 (0xf0), region = 32  ;;  %344 = vmatprep.mubr.f32.mxu0 (!%p186_p3), %v562_v0  ;;  %536 = vset.pattern.permute.xlu0 (!%p186_p3), %v563_v2  ;;  %v262_v5 = vld [vmem:[%s624_s1] sm:$0xf] (!%p186_p3)  ;;  %vm271_vm1 = vcmask (!%p186_p3), 31744  }
   0x8   : > { %266 = vperm.xlu0 (!%p186_p3), %536, %v263_v1  }
   0xe   : > { %s632_s12 = smov (!%p230_p4, %s552_s12), 1 }
   0xf   : > { %s508_s18 = sshll.u32 %s632_s12, 3 }
  0x10   : > { %s237_s21 = scalar_lea.vmem %s623_s0, %s508_s18  ;;  %s259_s26 = scalar_lea.vmem %s626_s3, %s508_s18 }
  0x11   : > { %v261_v3 = vld [vmem:[%s237_s21] sm:$0xff] }
  0x12   : > { %v270_v4 = vcombine.high %v261_v3, %v261_v3 }
  0x14   : > { %503 = vmatprep.subr.msk.mxu0 %vm275_vm0, %v270_v4 }
  0x15   : > { %504 = vmatpush1.msk.msra.mxu0 %vm275_vm0, %v261_v3 }
  0x16   : > { %505 = vmatmul.mubr.msk.f32.vlgmr.msra.gmra.mrb[0].mxu0 %vm271_vm1, %v262_v5 }
  0x87   : > { %v267_v6 = vpop.permute.xlu0 %266 }
  0xe9   : > { %v346_v7 = vpop.f32.mrb[0].mxu0 }
  0xea   : > { %v347_v8 = vadd.f32 %v346_v7, %v267_v6  ;;  %v348_v9 = vpop.f32.mrb[1].mxu0 }
  0xeb   : > { %v349_v10 = vadd.f32 %v348_v9, %v267_v6 }
  0xed   : > { %v353_v11 = vcombine.low %v347_v8, %v349_v10 }
  0xef   : > { %355 = vst [vmem:[%s259_s26] sm:$0xff] %v353_v11 }
  0xf0 PF: > { %s13_s14 = sadd.s32 1, %s560_s14   ;;  %s627_s12 = smov %s556_s13 }
  0xf1   : > { %p10_p5 = scmp.ge.s32.totalorder %s13_s14, 4   ;;  %s628_s13 = smov %s630_s15 }
  0xf3   :  { %12 = sbr.rel (!%p10_p5) target bundleno = 2 (0x2), region = 68 }

</bundles_post_ra>
